<compile_context>
chip_gen: v5e
topology: v5e:2x2
jax: 0.10.0
libtpu: 0.0.40
codegen_flags: <defaults>
</compile_context>

<pallas_src>
import functools
import math

import numpy as np
import jax
import jax.numpy as jnp
from jax.experimental import pallas as pl
from jax.experimental.pallas import tpu as pltpu

# ----------------------------- model config ---------------------------------
R_MAX = 5.0
NUM_BESSEL = 8
NUM_POLY_CUTOFF = 5          # polynomial cutoff exponent p
MAX_ELL = 2
NUM_SH = (MAX_ELL + 1) ** 2  # 9
NUM_INTERACTIONS = 2
NUM_ELEMENTS = 4
NUM_FEATURES = 32            # C  = hidden_irreps.count("0e")
NUM_HEADS = 1
MLP_DIM = 16                 # MLP_irreps = "16x0e"
AVG_NUM_NEIGHBORS = 4.0
RADIAL_MLP = [64, 64, 64]

CL = NUM_FEATURES * NUM_SH                      # 288
D_IN = [NUM_FEATURES, NUM_FEATURES * 4]         # interaction input dims: 32, 128
D_HID = [NUM_FEATURES * 4, NUM_FEATURES]        # hidden dims: 128 ("32x0e+32x1o"), 32 ("32x0e")

VMEM_LIMIT = 48 * 1024 * 1024   # safe on v5e/v6e (128 MiB) and v7x (64 MiB)


# ----------------------------- small helpers ---------------------------------
def _round_up(x, m):
    return ((x + m - 1) // m) * m


def _pad_rows(x, rows):
    pad = [(0, rows - x.shape[0])] + [(0, 0)] * (x.ndim - 1)
    return jnp.pad(x, pad)


def _pick_row_tile(n, max_tile=256):
    """Largest row tile <= max_tile; keep >=2 tiles when N allows (v7x megacore)."""
    tn = min(max_tile, _round_up(n, 8))
    if n >= 16 and _round_up(n, tn) // tn < 2:
        tn = _round_up((n + 1) // 2, 8)
    return tn


def _make_expansion_matrices():
    """Constant bf16 matrices mapping (E,C) and (E,L) onto the (E, C*L) message layout."""
    ec = np.zeros((NUM_FEATURES, CL), np.float32)   # snd_exp[:, c*L+l] = snd[:, c]
    el = np.zeros((NUM_SH, CL), np.float32)         # sh_tile[:, c*L+l] = sh[:, l]
    for c in range(NUM_FEATURES):
        for l in range(NUM_SH):
            ec[c, c * NUM_SH + l] = 1.0
            el[l, c * NUM_SH + l] = 1.0
    return jnp.asarray(ec, jnp.bfloat16), jnp.asarray(el, jnp.bfloat16)


def _make_skip_expansion(num_elements, din):
    """Constant bf16 matrices building xz[:, z*din+d] = attr[:, z] * nf[:, d]."""
    ea = np.zeros((num_elements, num_elements * din), np.float32)
    en = np.zeros((din, num_elements * din), np.float32)
    for z in range(num_elements):
        for d in range(din):
            ea[z, z * din + d] = 1.0
            en[d, z * din + d] = 1.0
    return jnp.asarray(ea, jnp.bfloat16), jnp.asarray(en, jnp.bfloat16)


def _build_scatter_tables(recv_sorted_np, np_nodes, tn, te, num_et):
    """Per-node-tile edge-block start table + counts (host preprocessing)."""
    num_nt = np_nodes // tn
    tiles = np.arange(num_nt, dtype=np.int64)
    starts = np.searchsorted(recv_sorted_np, tiles * tn, side="left")
    stops = np.searchsorted(recv_sorted_np, (tiles + 1) * tn, side="left")
    blk_lo = starts // te
    cnt = np.where(stops > starts, (stops - 1) // te + 1 - blk_lo, 0).astype(np.int32)
    max_blocks = int(max(1, cnt.max())) if num_nt > 0 else 1
    b_idx = np.arange(max_blocks)[None, :]
    bb = np.minimum(b_idx, np.maximum(cnt[:, None] - 1, 0))
    tbl = np.minimum(blk_lo[:, None] + bb, num_et - 1).astype(np.int32)
    return (jnp.asarray(tbl.reshape(-1), jnp.int32),
            jnp.asarray(cnt, jnp.int32),
            max_blocks)


# ----------------------------- generic tiled linear --------------------------
def _linear_kernel(x_ref, w_ref, o_ref, *, act, mxu_bf16):
    x = x_ref[...]
    w = w_ref[...]
    if mxu_bf16:
        x = x.astype(jnp.bfloat16)
        w = w.astype(jnp.bfloat16)
    y = jnp.dot(x, w, preferred_element_type=jnp.float32)
    if act == "silu":
        y = y * jax.nn.sigmoid(y)
    o_ref[...] = y


def pallas_linear(x, w, act="none", mxu_bf16=False, block_rows=256):
    """o = act(x @ w), tiled over rows (no bias path: MACE linears are bias-free)."""
    x = x.astype(jnp.float32)
    w = w.astype(jnp.float32)
    M, K = x.shape
    Kw, Nc = w.shape
    assert K == Kw
    TM = _pick_row_tile(M, block_rows)
    MP = _round_up(M, TM)
    xp = _pad_rows(x, MP)
    kern = functools.partial(_linear_kernel, act=act, mxu_bf16=mxu_bf16)
    out = pl.pallas_call(
        kern,
        grid=(MP // TM,),
        in_specs=[pl.BlockSpec((TM, K), lambda i: (i, 0)),
                  pl.BlockSpec((K, Nc), lambda i: (0, 0))],
        out_specs=pl.BlockSpec((TM, Nc), lambda i: (i, 0)),
        out_shape=jax.ShapeDtypeStruct((MP, Nc), jnp.float32),
        compiler_params=pltpu.CompilerParams(dimension_semantics=("parallel",)),
    )(xp, w)
    return out[:M]


# ----------------------------- embedding + atomic energies -------------------
def _embed_kernel(attr_ref, wemb_ref, aet_ref, feat_ref, e0_ref):
    # kept in f32: atomic reference energies feed the output energy directly.
    a = attr_ref[...]
    feat_ref[...] = jnp.dot(a, wemb_ref[...], preferred_element_type=jnp.float32)
    e0_ref[...] = jnp.dot(a, aet_ref[...], preferred_element_type=jnp.float32)


def pallas_embed(node_attrs, w_emb, ae_t, block_rows=256):
    N, Z = node_attrs.shape
    C = w_emb.shape[1]
    H = ae_t.shape[1]
    TN = min(block_rows, _round_up(N, 8))
    NP = _round_up(N, TN)
    ap = _pad_rows(node_attrs.astype(jnp.float32), NP)
    feats, e0 = pl.pallas_call(
        _embed_kernel,
        grid=(NP // TN,),
        in_specs=[pl.BlockSpec((TN, Z), lambda i: (i, 0)),
                  pl.BlockSpec((Z, C), lambda i: (0, 0)),
                  pl.BlockSpec((Z, H), lambda i: (0, 0))],
        out_specs=[pl.BlockSpec((TN, C), lambda i: (i, 0)),
                   pl.BlockSpec((TN, H), lambda i: (i, 0))],
        out_shape=[jax.ShapeDtypeStruct((NP, C), jnp.float32),
                   jax.ShapeDtypeStruct((NP, H), jnp.float32)],
        compiler_params=pltpu.CompilerParams(dimension_semantics=("parallel",)),
    )(ap, w_emb.astype(jnp.float32), ae_t.astype(jnp.float32))
    return feats[:N], e0[:N]


# ----------------- phase A: fused per-edge message pipeline ------------------
def _edge_message_kernel(vec_ref, snd_ref, wr0_ref, wr1_ref, wr2_ref, wro_ref,
                         ec_ref, el_ref, m_ref, *, r_max, num_bessel, p):
    bf = jnp.bfloat16

    # ---- edge geometry (rsqrt + multiplies; no divisions / sqrt) ------------
    v = vec_ref[...]                                       # (TE, 3) f32
    te = v.shape[0]
    r2 = jnp.sum(v * v, axis=1, keepdims=True)             # (TE, 1)
    rinv = jax.lax.rsqrt(r2 + 1e-18)                       # finite for padded zero edges
    r = r2 * rinv
    u = v * rinv
    x = u[:, 0:1]
    y = u[:, 1:2]
    z = u[:, 2:3]

    # ---- real spherical harmonics (component norm), single lane-dense tensor
    s3, s5, s15 = math.sqrt(3.0), math.sqrt(5.0), math.sqrt(15.0)
    col9 = jax.lax.broadcasted_iota(jnp.int32, (te, NUM_SH), 1)
    sh = (jnp.where(col9 == 0, 1.0, 0.0)
          + jnp.where(col9 == 1, s3 * x, 0.0)
          + jnp.where(col9 == 2, s3 * y, 0.0)
          + jnp.where(col9 == 3, s3 * z, 0.0)
          + jnp.where(col9 == 4, s15 * x * z, 0.0)
          + jnp.where(col9 == 5, s15 * x * y, 0.0)
          + jnp.where(col9 == 6, s5 * (y * y - 0.5 * (x * x + z * z)), 0.0)
          + jnp.where(col9 == 7, s15 * y * z, 0.0)
          + jnp.where(col9 == 8, 0.5 * s15 * (z * z - x * x), 0.0))       # (TE, 9)

    # ---- Bessel radial embedding + polynomial cutoff (no pow -> no exp/log)
    n = (jax.lax.broadcasted_iota(jnp.int32, (te, num_bessel), 1) + 1).astype(jnp.float32)
    prefac = math.sqrt(2.0 / r_max)
    bessel = prefac * jnp.sin(n * (math.pi / r_max) * r) * rinv            # (TE, 8)
    xx = r * (1.0 / r_max)
    xp = xx
    for _ in range(p - 1):
        xp = xp * xx                                                       # x**p
    xp1 = xp * xx
    xp2 = xp1 * xx
    env = (1.0
           - ((p + 1.0) * (p + 2.0) / 2.0) * xp
           + (p * (p + 2.0)) * xp1
           - (p * (p + 1.0) / 2.0) * xp2)
    env = jnp.where(xx < 1.0, env, 0.0)
    ef = (bessel * env).astype(bf)                                         # (TE, 8)

    # ---- radial MLP (bf16 MXU operands, f32 accumulation / activations)
    h = jnp.dot(ef, wr0_ref[...], preferred_element_type=jnp.float32)
    h = h * jax.nn.sigmoid(h)
    h = jnp.dot(h.astype(bf), wr1_ref[...], preferred_element_type=jnp.float32)
    h = h * jax.nn.sigmoid(h)
    h = jnp.dot(h.astype(bf), wr2_ref[...], preferred_element_type=jnp.float32)
    h = h * jax.nn.sigmoid(h)
    tpw = jnp.dot(h.astype(bf), wro_ref[...], preferred_element_type=jnp.float32)  # (TE, CL)
    # NOTE: 1/avg_num_neighbors is already folded into wro by the caller.

    # ---- depthwise tensor-product message m[e, c*L+l] = tpw * h_snd[e,c] * Y[e,l]
    snd_exp = jnp.dot(snd_ref[...], ec_ref[...],
                      preferred_element_type=jnp.float32)                  # (TE, CL)
    sh_tile = jnp.dot(sh.astype(bf), el_ref[...],
                      preferred_element_type=jnp.float32)                  # (TE, CL)
    m_ref[...] = (tpw * snd_exp * sh_tile).astype(bf)


def pallas_edge_messages(vec_p, snd_p, w_r0, w_r1, w_r2, w_rout_scaled,
                         expand_c, expand_l, te):
    EP = vec_p.shape[0]
    C = snd_p.shape[1]
    cl = w_rout_scaled.shape[1]
    kern = functools.partial(_edge_message_kernel, r_max=R_MAX,
                             num_bessel=NUM_BESSEL, p=NUM_POLY_CUTOFF)
    return pl.pallas_call(
        kern,
        grid=(EP // te,),
        in_specs=[pl.BlockSpec((te, 3), lambda e: (e, 0)),
                  pl.BlockSpec((te, C), lambda e: (e, 0)),
                  pl.BlockSpec(w_r0.shape, lambda e: (0, 0)),
                  pl.BlockSpec(w_r1.shape, lambda e: (0, 0)),
                  pl.BlockSpec(w_r2.shape, lambda e: (0, 0)),
                  pl.BlockSpec(w_rout_scaled.shape, lambda e: (0, 0)),
                  pl.BlockSpec(expand_c.shape, lambda e: (0, 0)),
                  pl.BlockSpec(expand_l.shape, lambda e: (0, 0))],
        out_specs=pl.BlockSpec((te, cl), lambda e: (e, 0)),
        out_shape=jax.ShapeDtypeStruct((EP, cl), jnp.bfloat16),
        compiler_params=pltpu.CompilerParams(
            dimension_semantics=("parallel",),
            vmem_limit_bytes=VMEM_LIMIT),
    )(vec_p, snd_p, w_r0, w_r1, w_r2, w_rout_scaled, expand_c, expand_l)


# ----------------- phase B: receiver-sorted segment-sum scatter --------------
def _scatter_kernel(blk_ref, cnt_ref, recv_ref, m_ref, o_ref, *, tn, te):
    t = pl.program_id(0)
    b = pl.program_id(1)

    @pl.when(b == 0)
    def _():
        o_ref[...] = jnp.zeros_like(o_ref)

    @pl.when(b < cnt_ref[t])
    def _():
        # in-kernel one-hot mask: edge belongs to node row (receiver - tile_start)
        rows = jax.lax.broadcasted_iota(jnp.int32, (tn, te), 0) + t * tn
        oh = (rows == recv_ref[...]).astype(jnp.bfloat16)                  # (TN, TE)
        o_ref[...] += jnp.dot(oh, m_ref[...], preferred_element_type=jnp.float32)


def pallas_receiver_scatter(messages, recv_row, blk_tbl, blk_cnt, max_blocks,
                            np_nodes, tn, te):
    EP, cl = messages.shape
    num_nt = np_nodes // tn
    mb = max_blocks
    kern = functools.partial(_scatter_kernel, tn=tn, te=te)
    return pl.pallas_call(
        kern,
        grid_spec=pltpu.PrefetchScalarGridSpec(
            num_scalar_prefetch=2,
            grid=(num_nt, mb),
            in_specs=[pl.BlockSpec((1, te),
                                   lambda t, b, blk, cnt: (0, blk[t * mb + b])),
                      pl.BlockSpec((te, cl),
                                   lambda t, b, blk, cnt: (blk[t * mb + b], 0))],
            out_specs=pl.BlockSpec((tn, cl), lambda t, b, blk, cnt: (t, 0)),
        ),
        out_shape=jax.ShapeDtypeStruct((np_nodes, cl), jnp.float32),
        compiler_params=pltpu.CompilerParams(
            dimension_semantics=("parallel", "arbitrary"),
            vmem_limit_bytes=VMEM_LIMIT),
    )(blk_tbl, blk_cnt, recv_row, messages)


# ----------------- fused per-node tail: linear + skip + product + readout ----
def _node_update_kernel(*refs, nonlinear, num_features):
    if nonlinear:
        (agg_ref, nf_ref, attr_ref, wlin_ref, wsc_ref, wprod_ref, ea_ref, en_ref,
         wa_ref, wb_ref, nf_out_ref, ro_out_ref) = refs
    else:
        (agg_ref, nf_ref, attr_ref, wlin_ref, wsc_ref, wprod_ref, ea_ref, en_ref,
         wro_ref, nf_out_ref, ro_out_ref) = refs

    bf = jnp.bfloat16

    # interaction linear mix on the aggregated messages
    feats_inter = jnp.dot(agg_ref[...].astype(bf), wlin_ref[...],
                          preferred_element_type=jnp.float32)              # (TN, CL)

    # element-conditioned skip (FullyConnectedTensorProduct w/ node_attrs) as
    # ONE matmul with contraction depth Z*Din; xz built with two tiny constant
    # expansion matmuls (lane-layout friendly, no reshape relayout).
    attr_exp = jnp.dot(attr_ref[...].astype(bf), ea_ref[...],
                       preferred_element_type=jnp.float32)                 # (TN, Z*Din)
    nf_tile = jnp.dot(nf_ref[...].astype(bf), en_ref[...],
                      preferred_element_type=jnp.float32)                  # (TN, Z*Din)
    xz = (attr_exp * nf_tile).astype(bf)
    sc = jnp.dot(xz, wsc_ref[...], preferred_element_type=jnp.float32)     # (TN, Dh)

    # product basis -> hidden (+ residual skip)
    new_nf = jnp.dot(feats_inter.astype(bf), wprod_ref[...],
                     preferred_element_type=jnp.float32) + sc
    nf_out_ref[...] = new_nf

    # readout on scalar channels
    scal = new_nf[:, :num_features]
    if nonlinear:
        hh = jnp.dot(scal.astype(bf), wa_ref[...], preferred_element_type=jnp.float32)
        hh = hh * jax.nn.sigmoid(hh)                                        # SiLU gate
        ro_out_ref[...] = jnp.dot(hh.astype(bf), wb_ref[...],
                                  preferred_element_type=jnp.float32)
    else:
        ro_out_ref[...] = jnp.dot(scal.astype(bf), wro_ref[...],
                                  preferred_element_type=jnp.float32)


def pallas_node_update(agg, node_feats, node_attrs, w_lin, w_sc_flat, w_prod,
                       ea, en, ro_weights, nonlinear, num_features, block_rows=256):
    N, cl = agg.shape
    Din = node_feats.shape[1]
    Z = node_attrs.shape[1]
    Dh = w_prod.shape[1]
    H = ro_weights[-1].shape[1]
    TN = _pick_row_tile(N, block_rows)
    NP = _round_up(N, TN)

    agg_p = _pad_rows(agg.astype(jnp.float32), NP)
    nf_p = _pad_rows(node_feats.astype(jnp.float32), NP)
    at_p = _pad_rows(node_attrs.astype(jnp.float32), NP)

    bf = jnp.bfloat16
    w_lin_b = w_lin.astype(bf)
    w_sc_b = w_sc_flat.astype(bf)
    w_prod_b = w_prod.astype(bf)
    ro_b = [w.astype(bf) for w in ro_weights]

    in_specs = [pl.BlockSpec((TN, cl), lambda i: (i, 0)),
                pl.BlockSpec((TN, Din), lambda i: (i, 0)),
                pl.BlockSpec((TN, Z), lambda i: (i, 0)),
                pl.BlockSpec(w_lin_b.shape, lambda i: (0, 0)),
                pl.BlockSpec(w_sc_b.shape, lambda i: (0, 0)),
                pl.BlockSpec(w_prod_b.shape, lambda i: (0, 0)),
                pl.BlockSpec(ea.shape, lambda i: (0, 0)),
                pl.BlockSpec(en.shape, lambda i: (0, 0))]
    args = [agg_p, nf_p, at_p, w_lin_b, w_sc_b, w_prod_b, ea, en]
    for w in ro_b:
        in_specs.append(pl.BlockSpec(w.shape, lambda i: (0, 0)))
        args.append(w)

    kern = functools.partial(_node_update_kernel, nonlinear=nonlinear,
                             num_features=num_features)
    nf_out, ro = pl.pallas_call(
        kern,
        grid=(NP // TN,),
        in_specs=in_specs,
        out_specs=[pl.BlockSpec((TN, Dh), lambda i: (i, 0)),
                   pl.BlockSpec((TN, H), lambda i: (i, 0))],
        out_shape=[jax.ShapeDtypeStruct((NP, Dh), jnp.float32),
                   jax.ShapeDtypeStruct((NP, H), jnp.float32)],
        compiler_params=pltpu.CompilerParams(dimension_semantics=("parallel",)),
    )(*args)
    return nf_out[:N], ro[:N]


# ----------------------------- parameters ------------------------------------
def init_params(key):
    keys = iter(jax.random.split(key, 64))

    def lin(shape):
        fan_in = shape[0]
        return jax.random.normal(next(keys), shape, jnp.float32) / math.sqrt(fan_in)

    params = {
        "atomic_energies": jax.random.normal(next(keys), (NUM_HEADS, NUM_ELEMENTS), jnp.float32),
        "w_emb": lin((NUM_ELEMENTS, NUM_FEATURES)),
        "layers": [],
    }
    for i in range(NUM_INTERACTIONS):
        lp = {
            "w_up": lin((D_IN[i], NUM_FEATURES)),
            "w_r0": lin((NUM_BESSEL, RADIAL_MLP[0])),
            "w_r1": lin((RADIAL_MLP[0], RADIAL_MLP[1])),
            "w_r2": lin((RADIAL_MLP[1], RADIAL_MLP[2])),
            "w_rout": lin((RADIAL_MLP[2], CL)),
            "w_lin": lin((CL, CL)),
            "w_sc": lin((NUM_ELEMENTS * D_IN[i], D_HID[i])),   # element-wise skip TP
            "w_prod": lin((CL, D_HID[i])),                     # product-basis -> hidden
        }
        if i < NUM_INTERACTIONS - 1:
            lp["w_ro"] = lin((NUM_FEATURES, NUM_HEADS))                      # LinearReadout
        else:
            lp["w_ro_a"] = lin((NUM_FEATURES, NUM_HEADS * MLP_DIM))          # NonLinearReadout
            lp["w_ro_b"] = lin((NUM_HEADS * MLP_DIM, NUM_HEADS))
        params["layers"].append(lp)
    return params


# ----------------------------- forward pass ----------------------------------
def mace_forward(params, data):
    node_attrs = data["node_attrs"].astype(jnp.float32)     # (N, num_elements) one-hot
    positions = data["positions"].astype(jnp.float32)        # (N, 3)
    edge_index = data["edge_index"]                           # (2, E)
    shifts = data["shifts"].astype(jnp.float32)               # (E, 3)
    batch = data["batch"]                                     # (N,)
    ptr = data["ptr"]

    N = node_attrs.shape[0]
    E = edge_index.shape[1]
    num_graphs = ptr.shape[0] - 1
    node_heads = jnp.zeros_like(batch)                        # no 'head' key -> zeros
    displacement = jnp.zeros((num_graphs, 3, 3), jnp.float32)
    arange_n = jnp.arange(N)

    sender = edge_index[0]
    receiver = edge_index[1]

    # ----- receiver-sorted segment-sum preprocessing (host glue) -------------
    order = jnp.argsort(receiver)
    recv_sorted = receiver[order].astype(jnp.int32)
    send_sorted = sender[order]
    shifts_sorted = shifts[order]

    TE = min(1024, _round_up(max(E, 1), 128))                 # edge tile (both phases)
    EP = _round_up(max(E, 1), TE)
    num_et = EP // TE
    TN_SC = _pick_row_tile(N, 256)                            # node tile for scatter
    NP = _round_up(N, TN_SC)

    # padded receivers use sentinel NP (never matches a node row)
    recv_pad = jnp.concatenate(
        [recv_sorted, jnp.full((EP - E,), NP, jnp.int32)]) if EP > E else recv_sorted
    recv_row = recv_pad.reshape(1, EP)
    recv_np = np.asarray(jax.device_get(recv_pad))
    blk_tbl, blk_cnt, max_blocks = _build_scatter_tables(recv_np, NP, TN_SC, TE, num_et)

    # edge vectors in receiver-sorted order (gather is glue)
    vec_sorted = positions[recv_sorted] - positions[send_sorted] + shifts_sorted
    vec_p = _pad_rows(vec_sorted.astype(jnp.float32), EP)

    graph_oh = (batch[None, :] == jnp.arange(num_graphs)[:, None]).astype(jnp.float32)  # (G, N)

    # fused node embedding + atomic reference energies (one kernel, two outputs)
    node_feats, ae_all = pallas_embed(node_attrs, params["w_emb"],
                                      params["atomic_energies"].T)           # (N,C), (N,H)
    node_e0 = ae_all[arange_n, node_heads]                                   # (N,)

    expand_c, expand_l = _make_expansion_matrices()
    inv_avg = 1.0 / AVG_NUM_NEIGHBORS

    node_energies_list = [node_e0]
    node_feats_list = []

    for i in range(NUM_INTERACTIONS):
        lp = params["layers"][i]

        # up-projection of node features, then sender gather in sorted edge order (glue)
        h_up = pallas_linear(node_feats, lp["w_up"], mxu_bf16=True)          # (N, C)
        snd_p = _pad_rows(h_up[send_sorted].astype(jnp.bfloat16), EP)        # (EP, C) bf16

        # phase A: SH + Bessel + cutoff + radial MLP + depthwise TP, once per edge
        w_rout_scaled = (lp["w_rout"] * inv_avg).astype(jnp.bfloat16)        # fold 1/avg
        messages = pallas_edge_messages(vec_p, snd_p,
                                        lp["w_r0"].astype(jnp.bfloat16),
                                        lp["w_r1"].astype(jnp.bfloat16),
                                        lp["w_r2"].astype(jnp.bfloat16),
                                        w_rout_scaled, expand_c, expand_l, TE)

        # phase B: receiver-sorted segment-sum scatter (prefetched block table)
        agg = pallas_receiver_scatter(messages, recv_row, blk_tbl, blk_cnt,
                                      max_blocks, NP, TN_SC, TE)[:N]         # (N, C*L)

        # fused per-node tail: linear mix + element-conditioned skip + product + readout
        if i < NUM_INTERACTIONS - 1:
            ro_w = [lp["w_ro"]]
        else:
            ro_w = [lp["w_ro_a"], lp["w_ro_b"]]
        ea, en = _make_skip_expansion(NUM_ELEMENTS, D_IN[i])
        node_feats, ro = pallas_node_update(
            agg, node_feats, node_attrs, lp["w_lin"], lp["w_sc"], lp["w_prod"],
            ea, en, ro_w,
            nonlinear=(i == NUM_INTERACTIONS - 1),
            num_features=NUM_FEATURES)

        node_feats_list.append(node_feats)
        node_energies_list.append(ro[arange_n, node_heads])

    node_feats_out = jnp.concatenate(node_feats_list, axis=-1)               # (N, 160)
    node_energy_contributions = jnp.stack(node_energies_list, axis=-1)       # (N, 1+num_int)
    node_energy = jnp.sum(node_energy_contributions, axis=-1)                # (N,)

    # per-graph scatter-sum of every energy contribution as one (small) matmul (kept f32)
    contributions = pallas_linear(graph_oh, node_energy_contributions)       # (G, 1+num_int)
    total_energy = jnp.sum(contributions, axis=-1)                           # (G,)

    # TODO(synk): forces/virials/stress/hessian need autograd through pallas_call.
    return {
        "energy": total_energy,
        "node_energy": node_energy,
        "contributions": contributions,
        "forces": None,
        "virials": None,
        "stress": None,
        "displacement": displacement,
        "hessian": None,
        "node_feats": node_feats_out,
    }


# ----------------------------- demo -------------------------------------------
if __name__ == "__main__":
    key = jax.random.PRNGKey(0)
    kpos, kelem, kparam = jax.random.split(key, 3)

    N, G = 8, 2
    positions = jax.random.normal(kpos, (N, 3), jnp.float32) * 1.5
    elems = jax.random.randint(kelem, (N,), 0, NUM_ELEMENTS)
    node_attrs = jax.nn.one_hot(elems, NUM_ELEMENTS, dtype=jnp.float32)
    batch = jnp.array([0, 0, 0, 0, 1, 1, 1, 1], jnp.int32)
    ptr = jnp.array([0, 4, 8], jnp.int32)

    # bidirectional ring edges inside each graph of 4 atoms -> E = 16
    senders, receivers = [], []
    for g in range(G):
        base = 4 * g
        for a in range(4):
            b = base + (a + 1) % 4
            senders += [base + a, b]
            receivers += [b, base + a]
    edge_index = jnp.array([senders, receivers], jnp.int32)
    E = edge_index.shape[1]
    shifts = jnp.zeros((E, 3), jnp.float32)
    cell = jnp.zeros((G, 3, 3), jnp.float32)

    data = dict(node_attrs=node_attrs, positions=positions, edge_index=edge_index,
                shifts=shifts, batch=batch, ptr=ptr, cell=cell)

    params = init_params(kparam)
    out = mace_forward(params, data)
    jax.block_until_ready(out["energy"])
    assert out["energy"].shape == (G,)
    assert out["node_energy"].shape == (N,)
    assert out["contributions"].shape == (G, NUM_INTERACTIONS + 1)
    assert out["node_feats"].shape == (N, sum(D_HID))
    assert bool(jnp.all(jnp.isfinite(out["energy"])))
    print("KERNEL_OK")
</pallas_src>

<mosaic_0001>
module attributes {stable_mosaic.version = 11 : i64} {
  func.func @_embed_kernel(%arg0: i32, %arg1: memref<8x4xf32, #tpu.memory_space<vmem>>, %arg2: memref<4x32xf32, #tpu.memory_space<vmem>>, %arg3: memref<4x1xf32, #tpu.memory_space<vmem>>, %arg4: memref<8x32xf32, #tpu.memory_space<vmem>>, %arg5: memref<8x1xf32, #tpu.memory_space<vmem>>) attributes {dimension_semantics = [#tpu.dimension_semantics<parallel>], iteration_bounds = array<i64: 1>, scalar_prefetch = 0 : i64, scratch_operands = 0 : i64, tpu.core_type = #tpu.core_type<tc>, window_params = [{transform_indices = @transform_0, window_bounds = array<i64: 8, 4>}, {pipeline_mode = #tpu.pipeline_mode<synchronous>, transform_indices = @transform_1, window_bounds = array<i64: 4, 32>}, {pipeline_mode = #tpu.pipeline_mode<synchronous>, transform_indices = @transform_2, window_bounds = array<i64: 4, 1>}, {transform_indices = @transform_3, window_bounds = array<i64: 8, 32>}, {transform_indices = @transform_4, window_bounds = array<i64: 8, 1>}]} {
    %c0 = arith.constant 0 : index
    %c0_0 = arith.constant 0 : index
    %0 = vector.load %arg1[%c0, %c0_0] : memref<8x4xf32, #tpu.memory_space<vmem>>, vector<8x4xf32>
    %c0_1 = arith.constant 0 : index
    %c0_2 = arith.constant 0 : index
    %1 = vector.load %arg2[%c0_1, %c0_2] : memref<4x32xf32, #tpu.memory_space<vmem>>, vector<4x32xf32>
    %cst = arith.constant dense<0.000000e+00> : vector<8x32xf32>
    %2 = tpu.matmul %0, %1, %cst {dimension_numbers = #tpu.dot_dimension_numbers<[1], [0], [0], [1], [0, 0, 1, 1], [], []>} : vector<8x4xf32>, vector<4x32xf32>, vector<8x32xf32> -> vector<8x32xf32>
    %c0_3 = arith.constant 0 : index
    %c0_4 = arith.constant 0 : index
    %3 = vector.load %arg4[%c0_3, %c0_4] : memref<8x32xf32, #tpu.memory_space<vmem>>, vector<8x32xf32>
    tpu.vector_store %arg4[%c0_3, %c0_4], %2 {strides = array<i32>} : memref<8x32xf32, #tpu.memory_space<vmem>>, vector<8x32xf32>,
    %c0_5 = arith.constant 0 : index
    %c0_6 = arith.constant 0 : index
    %4 = vector.load %arg3[%c0_5, %c0_6] : memref<4x1xf32, #tpu.memory_space<vmem>>, vector<4x1xf32>
    %cst_7 = arith.constant dense<0.000000e+00> : vector<8x1xf32>
    %5 = tpu.matmul %0, %4, %cst_7 {dimension_numbers = #tpu.dot_dimension_numbers<[1], [0], [0], [1], [0, 0, 1, 1], [], []>} : vector<8x4xf32>, vector<4x1xf32>, vector<8x1xf32> -> vector<8x1xf32>
    %c0_8 = arith.constant 0 : index
    %c0_9 = arith.constant 0 : index
    %6 = vector.load %arg5[%c0_8, %c0_9] : memref<8x1xf32, #tpu.memory_space<vmem>>, vector<8x1xf32>
    tpu.vector_store %arg5[%c0_8, %c0_9], %5 {strides = array<i32>} : memref<8x1xf32, #tpu.memory_space<vmem>>, vector<8x1xf32>,
    return
  }
  func.func @transform_0(%arg0: i32) -> (i32, i32) {
    %c0_i32 = arith.constant 0 : i32
    %c0_i32_0 = arith.constant 0 : i32
    return %arg0, %c0_i32 : i32, i32
  }
  func.func @transform_1(%arg0: i32) -> (i32, i32) {
    %c0_i32 = arith.constant 0 : i32
    %c0_i32_0 = arith.constant 0 : i32
    %c0_i32_1 = arith.constant 0 : i32
    return %c0_i32, %c0_i32_0 : i32, i32
  }
  func.func @transform_2(%arg0: i32) -> (i32, i32) {
    %c0_i32 = arith.constant 0 : i32
    %c0_i32_0 = arith.constant 0 : i32
    %c0_i32_1 = arith.constant 0 : i32
    return %c0_i32, %c0_i32_0 : i32, i32
  }
  func.func @transform_3(%arg0: i32) -> (i32, i32) {
    %c0_i32 = arith.constant 0 : i32
    %c0_i32_0 = arith.constant 0 : i32
    return %arg0, %c0_i32 : i32, i32
  }
  func.func @transform_4(%arg0: i32) -> (i32, i32) {
    %c0_i32 = arith.constant 0 : i32
    %c0_i32_0 = arith.constant 0 : i32
    return %arg0, %c0_i32 : i32, i32
  }
}

</mosaic_0001>

<bundles_post_ra>
// kernel: tpu_custom_call.1
= control target key start
LH: loop header
LB: loop body
LE: loop exit
PB: predicated region body
PF: predicated region fallthrough
CT: control target
= control target key end

     0   :  { %vm23_vm0 = vcmask 1043456   ;;  %vm19_vm1 = vcmask 31744   ;;  %s167_s0 = inlined_call_operand.vmem [shape: f32[8,4], index: 0, kind: input, shape index: {}]   ;;  %s168_s1 = inlined_call_operand.vmem [shape: f32[4,32], index: 1, kind: input, shape index: {}]   ;;  %s169_s2 = inlined_call_operand.vmem [shape: f32[4,1], index: 2, kind: input, shape index: {}]   ;;  %s170_s3 = inlined_call_operand.hbm [shape: f32[8,32], index: 3, kind: output, shape index: {0}]   ;;  %s171_s4 = inlined_call_operand.vmem [shape: f32[8,1], index: 4, kind: output, shape index: {1}]  }
   0x1   :  { %v18_v0 = vld [vmem:[%s168_s1] sm:$0xf] }
   0x2   :  { %v17_v1 = vld [vmem:[%s167_s0] sm:$0xff]  ;;  %95 = vmatpush.msk.msra.mxu0 %vm23_vm0, %v18_v0 }
   0x3   :  { %v49_v2 = vld [vmem:[%s169_s2] sm:$0xf] }
   0x4   :  { %10 = vsyncpa [#allocation3], 0  ;;  %96 = vmatmul.msk.f32.vlgmr.msra.gmra.mxu0 %vm19_vm1, %v17_v1  ;;  %97 = vmatpush.msk.msra.mxu1 %vm23_vm0, %v49_v2  ;;  %s126_s21 = smov [#allocation2]   ;;  %s82_s1 = sshll.u32 %s170_s3, 4  ;;  %vm47_vm2 = vcmask 261120   ;;  %vm73_vm3 = vcmask 7168   ;;  %s83_s1 = int_to_ptr.hbm [resolvable:$true] %s82_s1 }
   0x5   :  { %98 = vmatmul.msk.f32.vlgmr.msra.gmra.mxu1 %vm19_vm1, %v17_v1  ;;  %s80_s22 = sshll.u32 %s126_s21, 4  ;;  %s81_s22 = int_to_ptr.vmem [resolvable:$true] %s80_s22 }
  0x81   :  { %v44_v3 = vpop.f32.mrf.mxu0 }
  0x82   :  { %48 = vst.msk [vmem:[#allocation2] sm:$0xff] %vm47_vm2, %v44_v3  ;;  %v70_v4 = vpop.f32.mrf.mxu1 }
  0x83   :  { %74 = vst.msk [vmem:[%s171_s4] sm:$0xff] %vm73_vm3, %v70_v4  ;;  %85 = dma.vmem_to_hbm [thread:$0]  %s81_s22, 128, %s83_s1, [#allocation3]  }
  0x84   :  { %124 = dma.done.wait [#allocation3], 128  }
  0x85   :  { %125 = vsyncadd [#allocation3], 4294967168 }
  0x86   :  { %94 = vsyncpa [#allocation3], 1 }

</bundles_post_ra>
